<compile_context>
chip_gen: v7x
topology: tpu7x:2x2x1
jax: 0.10.0
libtpu: 0.0.40
codegen_flags: <defaults>
</compile_context>

<pallas_src>
import math

import jax
import jax.numpy as jnp
from jax.experimental import pallas as pl
from jax.experimental.pallas import tpu as pltpu

H1 = 120    # fc1 logical width
H1P = 128   # fc1 width padded to a full lane group
H2 = 84     # fc2 width
H3 = 10     # fc3 width


def _herd_kernel(x_ref, w1_ref, b1_ref, w2_ref, b2_ref, w3_ref, b3_ref, o_ref):
    """One net-tile per grid step; all tile weights are VMEM-resident.

    x_ref : (B, D)              bf16   (shared across the herd)
    w1_ref: (D, n_tile*128)     bf16   (fc1 weights, zero-padded, concatenated)
    b1_ref: (1, n_tile*128)     f32    (zero-padded)
    w2_ref: (n_tile, 128, 84)   bf16   (rows 120..127 are zero)
    b2_ref: (n_tile, 1, 84)     f32
    w3_ref: (n_tile, 84, 10)    bf16
    b3_ref: (n_tile, 1, 10)     f32
    o_ref : (B, n_tile*10)      f32    (lane-dense output slab for this tile)
    """
    n_tile = w2_ref.shape[0]
    x = x_ref[...]                                            # (B, D) bf16

    # ---- fc1, fused across the net tile: one wide MXU matmul ----
    h1 = jnp.dot(x, w1_ref[...], preferred_element_type=jnp.float32)
    h1 = jnp.maximum(h1 + b1_ref[...], 0.0).astype(x.dtype)   # (B, n_tile*128)

    # ---- fc2 / fc3 per net (n_tile <= 16 -> static unroll is fine) ----
    outs = []
    for n in range(n_tile):
        h1n = h1[:, n * H1P:(n + 1) * H1P]                    # lane-aligned 128-wide view
        h2 = jnp.dot(h1n, w2_ref[n], preferred_element_type=jnp.float32)
        h2 = jnp.maximum(h2 + b2_ref[n], 0.0).astype(x.dtype)  # (B, 84) bf16
        o = jnp.dot(h2, w3_ref[n], preferred_element_type=jnp.float32)
        outs.append(o + b3_ref[n])                            # (B, 10) f32

    # Single lane-dense store (instead of n_tile masked 10-lane partial stores).
    o_ref[...] = jnp.concatenate(outs, axis=-1).astype(o_ref.dtype)


def prepare_params(params):
    """One-time weight re-layout.  Call ONCE and cache the result; this keeps
    the per-forward HBM traffic at exactly what the kernel reads.

    params (float32): w1 (N,D,120) b1 (N,120) w2 (N,120,84) b2 (N,84)
                      w3 (N,84,10) b3 (N,10)
    """
    w1, b1 = params["w1"], params["b1"]
    w2, b2 = params["w2"], params["b2"]
    w3, b3 = params["w3"], params["b3"]
    N, D, _ = w1.shape

    # fc1: zero-pad 120 -> 128 per net, then fuse across the herd: (D, N*128).
    w1p = jnp.pad(w1, ((0, 0), (0, 0), (0, H1P - H1)))
    w1p = jnp.transpose(w1p, (1, 0, 2)).reshape(D, N * H1P).astype(jnp.bfloat16)
    b1p = jnp.pad(b1, ((0, 0), (0, H1P - H1))).reshape(1, N * H1P)            # f32, pads=0
    # fc2: zero-pad rows 120 -> 128 so the padded h1 lanes contribute nothing.
    w2p = jnp.pad(w2, ((0, 0), (0, H1P - H1), (0, 0))).astype(jnp.bfloat16)   # (N,128,84)
    b2r = b2.reshape(N, 1, H2)                                                # f32
    w3b = w3.astype(jnp.bfloat16)                                             # (N,84,10)
    b3r = b3.reshape(N, 1, H3)                                                # f32
    return dict(w1p=w1p, b1p=b1p, w2p=w2p, b2r=b2r, w3b=w3b, b3r=b3r)


def _pick_net_tile(n_nets, max_tile=16):
    t = min(n_nets, max_tile)
    while n_nets % t:
        t -= 1
    return t


def combined_forward(x_nchw, prepped):
    """Returns (N, B, 10), matching torch.stack([net(x) for net in nets])."""
    B = x_nchw.shape[0]
    x_flat = x_nchw.reshape(B, -1).astype(jnp.bfloat16)   # torch.flatten(x, 1)
    D = x_flat.shape[1]

    w1p, b1p = prepped["w1p"], prepped["b1p"]
    w2p, b2r = prepped["w2p"], prepped["b2r"]
    w3b, b3r = prepped["w3b"], prepped["b3r"]
    N = w2p.shape[0]

    n_tile = _pick_net_tile(N)
    num_tiles = N // n_tile

    # Per-grid-step VMEM footprint (pipeline double-buffers the inputs);
    # set the scoped-VMEM limit explicitly (16 MiB default on v5e, 64 MiB
    # physical on v7x), clamped well below the v7x ceiling.
    per_step = (x_flat.size * 2
                + D * n_tile * H1P * 2 + n_tile * H1P * 4      # w1 / b1 tile
                + n_tile * H1P * H2 * 2 + n_tile * H2 * 4      # w2 / b2 tile
                + n_tile * H2 * H3 * 2 + n_tile * H3 * 4       # w3 / b3 tile
                + B * n_tile * H3 * 4                          # out tile
                + B * n_tile * H1P * 4)                        # h1 scratch
    vmem_limit = int(min(max(3 * per_step, 16 << 20), 48 << 20))

    flops = 2 * B * N * (D * H1P + H1P * H2 + H2 * H3)
    bytes_accessed = (2 * (x_flat.size + w1p.size + w2p.size + w3b.size)       # bf16
                      + 4 * (b1p.size + b2r.size + b3r.size + B * N * H3))     # f32

    grid_spec = pltpu.PrefetchScalarGridSpec(
        num_scalar_prefetch=0,
        grid=(num_tiles,),
        in_specs=[
            pl.BlockSpec((B, D), lambda i: (0, 0)),                 # x (shared)
            pl.BlockSpec((D, n_tile * H1P), lambda i: (0, i)),      # w1 fused/padded
            pl.BlockSpec((1, n_tile * H1P), lambda i: (0, i)),      # b1 padded
            pl.BlockSpec((n_tile, H1P, H2), lambda i: (i, 0, 0)),   # w2 padded rows
            pl.BlockSpec((n_tile, 1, H2), lambda i: (i, 0, 0)),     # b2
            pl.BlockSpec((n_tile, H2, H3), lambda i: (i, 0, 0)),    # w3
            pl.BlockSpec((n_tile, 1, H3), lambda i: (i, 0, 0)),     # b3
        ],
        out_specs=pl.BlockSpec((None, B, n_tile * H3), lambda i: (i, 0, 0)),
    )

    out_slab = pl.pallas_call(
        _herd_kernel,
        out_shape=jax.ShapeDtypeStruct((num_tiles, B, n_tile * H3), jnp.float32),
        grid_spec=grid_spec,
        compiler_params=pltpu.CompilerParams(
            dimension_semantics=("parallel",),      # v7x: herd split over both TCs
            vmem_limit_bytes=vmem_limit),
        cost_estimate=pl.CostEstimate(
            flops=flops, transcendentals=0, bytes_accessed=bytes_accessed),
    )(x_flat, w1p, b1p, w2p, b2r, w3b, b3r)

    # (num_tiles, B, n_tile*10) -> (N, B, 10)  (layout plumbing in the wrapper)
    out = out_slab.reshape(num_tiles, B, n_tile, H3)
    return out.transpose(0, 2, 1, 3).reshape(N, B, H3)


def init_params(key, n_nets, img_size):
    """Deterministic per-net parameters mimicking torch.nn.Linear init
    (uniform(-1/sqrt(fan_in), 1/sqrt(fan_in)))."""
    D = 1 * img_size * img_size
    dims = [(D, H1), (H1, H2), (H2, H3)]
    params = {}
    keys = jax.random.split(key, 6)
    for i, (fin, fout) in enumerate(dims):
        bound = 1.0 / math.sqrt(fin)
        params[f"w{i+1}"] = jax.random.uniform(
            keys[2 * i], (n_nets, fin, fout), jnp.float32, -bound, bound)
        params[f"b{i+1}"] = jax.random.uniform(
            keys[2 * i + 1], (n_nets, fout), jnp.float32, -bound, bound)
    return params


def reference_forward(x_nchw, params):
    """Pure-JAX reference mirroring the kernel's precision choices
    (bf16 weights/activations, f32 accumulation)."""
    B = x_nchw.shape[0]
    x = x_nchw.reshape(B, -1).astype(jnp.bfloat16).astype(jnp.float32)
    w1 = params["w1"].astype(jnp.bfloat16).astype(jnp.float32)
    w2 = params["w2"].astype(jnp.bfloat16).astype(jnp.float32)
    w3 = params["w3"].astype(jnp.bfloat16).astype(jnp.float32)
    h1 = jax.nn.relu(
        jnp.einsum("bd,ndh->nbh", x, w1, precision="highest")
        + params["b1"][:, None, :])
    h1 = h1.astype(jnp.bfloat16).astype(jnp.float32)
    h2 = jax.nn.relu(
        jnp.einsum("nbd,ndh->nbh", h1, w2, precision="highest")
        + params["b2"][:, None, :])
    h2 = h2.astype(jnp.bfloat16).astype(jnp.float32)
    return (jnp.einsum("nbd,ndh->nbh", h2, w3, precision="highest")
            + params["b3"][:, None, :])


if __name__ == "__main__":
    herd_size = 2
    n_nets = 2 * herd_size   # forward() doubles the herd before stacking
    img_size = 16
    batch = 2

    key = jax.random.PRNGKey(0)
    k_x, k_p = jax.random.split(key)
    x = jax.random.normal(k_x, (batch, 1, img_size, img_size), jnp.float32)
    params = init_params(k_p, n_nets, img_size)

    # One-time weight re-layout (cached across forwards in a real serving path).
    prepped = jax.block_until_ready(prepare_params(params))

    fwd = jax.jit(combined_forward)
    out = jax.block_until_ready(fwd(x, prepped))
    ref = reference_forward(x, params)

    assert out.shape == (n_nets, batch, 10), out.shape
    assert jnp.allclose(out, ref, atol=1e-2, rtol=1e-2), "mismatch vs reference"

    print("KERNEL_OK")
</pallas_src>

<mosaic_0001>
module attributes {stable_mosaic.version = 11 : i64} {
  func.func @_herd_kernel(%arg0: i32, %arg1: memref<2x256xbf16, #tpu.memory_space<vmem>>, %arg2: memref<256x512xbf16, #tpu.memory_space<vmem>>, %arg3: memref<1x512xf32, #tpu.memory_space<vmem>>, %arg4: memref<4x128x84xbf16, #tpu.memory_space<vmem>>, %arg5: memref<4x1x84xf32, #tpu.memory_space<vmem>>, %arg6: memref<4x84x10xbf16, #tpu.memory_space<vmem>>, %arg7: memref<4x1x10xf32, #tpu.memory_space<vmem>>, %arg8: memref<1x2x40xf32, #tpu.memory_space<vmem>>) attributes {dimension_semantics = [#tpu.dimension_semantics<parallel>], iteration_bounds = array<i64: 1>, scalar_prefetch = 0 : i64, scratch_operands = 0 : i64, tpu.core_type = #tpu.core_type<tc>, window_params = [{pipeline_mode = #tpu.pipeline_mode<synchronous>, transform_indices = @transform_0, window_bounds = array<i64: 2, 256>}, {transform_indices = @transform_1, window_bounds = array<i64: 256, 512>}, {transform_indices = @transform_2, window_bounds = array<i64: 1, 512>}, {transform_indices = @transform_3, window_bounds = array<i64: 4, 128, 84>}, {transform_indices = @transform_4, window_bounds = array<i64: 4, 1, 84>}, {transform_indices = @transform_5, window_bounds = array<i64: 4, 84, 10>}, {transform_indices = @transform_6, window_bounds = array<i64: 4, 1, 10>}, {transform_indices = @transform_7, window_bounds = array<i64: 1, 2, 40>}]} {
    %c0 = arith.constant 0 : index
    %c0_0 = arith.constant 0 : index
    %0 = vector.load %arg1[%c0, %c0_0] : memref<2x256xbf16, #tpu.memory_space<vmem>>, vector<2x256xbf16>
    %c0_1 = arith.constant 0 : index
    %c0_2 = arith.constant 0 : index
    %1 = vector.load %arg2[%c0_1, %c0_2] : memref<256x512xbf16, #tpu.memory_space<vmem>>, vector<256x512xbf16>
    %cst = arith.constant dense<0.000000e+00> : vector<2x512xf32>
    %2 = tpu.matmul %0, %1, %cst {dimension_numbers = #tpu.dot_dimension_numbers<[1], [0], [0], [1], [0, 0, 1, 1], [], []>} : vector<2x256xbf16>, vector<256x512xbf16>, vector<2x512xf32> -> vector<2x512xf32>
    %c0_3 = arith.constant 0 : index
    %c0_4 = arith.constant 0 : index
    %3 = vector.load %arg3[%c0_3, %c0_4] : memref<1x512xf32, #tpu.memory_space<vmem>>, vector<1x512xf32>
    %4 = vector.broadcast %3 : vector<1x512xf32> to vector<2x512xf32>
    %5 = arith.addf %2, %4 : vector<2x512xf32>
    %cst_5 = arith.constant 0.000000e+00 : f32
    %6 = vector.broadcast %cst_5 : f32 to vector<2x512xf32>
    %7 = arith.maximumf %5, %6 : vector<2x512xf32>
    %8 = arith.truncf %7 : vector<2x512xf32> to vector<2x512xbf16>
    %9 = vector.extract_strided_slice %8 {offsets = [0, 0], sizes = [2, 128], strides = [1, 1]} : vector<2x512xbf16> to vector<2x128xbf16>
    %c0_6 = arith.constant 0 : index
    %c0_7 = arith.constant 0 : index
    %c0_8 = arith.constant 0 : index
    %10 = vector.load %arg4[%c0_6, %c0_7, %c0_8] : memref<4x128x84xbf16, #tpu.memory_space<vmem>>, vector<1x128x84xbf16>
    %11 = vector.shape_cast %10 : vector<1x128x84xbf16> to vector<128x84xbf16>
    %cst_9 = arith.constant dense<0.000000e+00> : vector<2x84xf32>
    %12 = tpu.matmul %9, %11, %cst_9 {dimension_numbers = #tpu.dot_dimension_numbers<[1], [0], [0], [1], [0, 0, 1, 1], [], []>} : vector<2x128xbf16>, vector<128x84xbf16>, vector<2x84xf32> -> vector<2x84xf32>
    %c0_10 = arith.constant 0 : index
    %c0_11 = arith.constant 0 : index
    %c0_12 = arith.constant 0 : index
    %13 = vector.load %arg5[%c0_10, %c0_11, %c0_12] : memref<4x1x84xf32, #tpu.memory_space<vmem>>, vector<1x1x84xf32>
    %14 = vector.shape_cast %13 : vector<1x1x84xf32> to vector<1x84xf32>
    %15 = vector.broadcast %14 : vector<1x84xf32> to vector<2x84xf32>
    %16 = arith.addf %12, %15 : vector<2x84xf32>
    %cst_13 = arith.constant 0.000000e+00 : f32
    %17 = vector.broadcast %cst_13 : f32 to vector<2x84xf32>
    %18 = arith.maximumf %16, %17 : vector<2x84xf32>
    %19 = arith.truncf %18 : vector<2x84xf32> to vector<2x84xbf16>
    %c0_14 = arith.constant 0 : index
    %c0_15 = arith.constant 0 : index
    %c0_16 = arith.constant 0 : index
    %20 = vector.load %arg6[%c0_14, %c0_15, %c0_16] : memref<4x84x10xbf16, #tpu.memory_space<vmem>>, vector<1x84x10xbf16>
    %21 = vector.shape_cast %20 : vector<1x84x10xbf16> to vector<84x10xbf16>
    %cst_17 = arith.constant dense<0.000000e+00> : vector<2x10xf32>
    %22 = tpu.matmul %19, %21, %cst_17 {dimension_numbers = #tpu.dot_dimension_numbers<[1], [0], [0], [1], [0, 0, 1, 1], [], []>} : vector<2x84xbf16>, vector<84x10xbf16>, vector<2x10xf32> -> vector<2x10xf32>
    %c0_18 = arith.constant 0 : index
    %c0_19 = arith.constant 0 : index
    %c0_20 = arith.constant 0 : index
    %23 = vector.load %arg7[%c0_18, %c0_19, %c0_20] : memref<4x1x10xf32, #tpu.memory_space<vmem>>, vector<1x1x10xf32>
    %24 = vector.shape_cast %23 : vector<1x1x10xf32> to vector<1x10xf32>
    %25 = vector.broadcast %24 : vector<1x10xf32> to vector<2x10xf32>
    %26 = arith.addf %22, %25 : vector<2x10xf32>
    %27 = vector.extract_strided_slice %8 {offsets = [0, 128], sizes = [2, 128], strides = [1, 1]} : vector<2x512xbf16> to vector<2x128xbf16>
    %c1 = arith.constant 1 : index
    %c0_21 = arith.constant 0 : index
    %c0_22 = arith.constant 0 : index
    %28 = vector.load %arg4[%c1, %c0_21, %c0_22] : memref<4x128x84xbf16, #tpu.memory_space<vmem>>, vector<1x128x84xbf16>
    %29 = vector.shape_cast %28 : vector<1x128x84xbf16> to vector<128x84xbf16>
    %cst_23 = arith.constant dense<0.000000e+00> : vector<2x84xf32>
    %30 = tpu.matmul %27, %29, %cst_23 {dimension_numbers = #tpu.dot_dimension_numbers<[1], [0], [0], [1], [0, 0, 1, 1], [], []>} : vector<2x128xbf16>, vector<128x84xbf16>, vector<2x84xf32> -> vector<2x84xf32>
    %c1_24 = arith.constant 1 : index
    %c0_25 = arith.constant 0 : index
    %c0_26 = arith.constant 0 : index
    %31 = vector.load %arg5[%c1_24, %c0_25, %c0_26] : memref<4x1x84xf32, #tpu.memory_space<vmem>>, vector<1x1x84xf32>
    %32 = vector.shape_cast %31 : vector<1x1x84xf32> to vector<1x84xf32>
    %33 = vector.broadcast %32 : vector<1x84xf32> to vector<2x84xf32>
    %34 = arith.addf %30, %33 : vector<2x84xf32>
    %cst_27 = arith.constant 0.000000e+00 : f32
    %35 = vector.broadcast %cst_27 : f32 to vector<2x84xf32>
    %36 = arith.maximumf %34, %35 : vector<2x84xf32>
    %37 = arith.truncf %36 : vector<2x84xf32> to vector<2x84xbf16>
    %c1_28 = arith.constant 1 : index
    %c0_29 = arith.constant 0 : index
    %c0_30 = arith.constant 0 : index
    %38 = vector.load %arg6[%c1_28, %c0_29, %c0_30] : memref<4x84x10xbf16, #tpu.memory_space<vmem>>, vector<1x84x10xbf16>
    %39 = vector.shape_cast %38 : vector<1x84x10xbf16> to vector<84x10xbf16>
    %cst_31 = arith.constant dense<0.000000e+00> : vector<2x10xf32>
    %40 = tpu.matmul %37, %39, %cst_31 {dimension_numbers = #tpu.dot_dimension_numbers<[1], [0], [0], [1], [0, 0, 1, 1], [], []>} : vector<2x84xbf16>, vector<84x10xbf16>, vector<2x10xf32> -> vector<2x10xf32>
    %c1_32 = arith.constant 1 : index
    %c0_33 = arith.constant 0 : index
    %c0_34 = arith.constant 0 : index
    %41 = vector.load %arg7[%c1_32, %c0_33, %c0_34] : memref<4x1x10xf32, #tpu.memory_space<vmem>>, vector<1x1x10xf32>
    %42 = vector.shape_cast %41 : vector<1x1x10xf32> to vector<1x10xf32>
    %43 = vector.broadcast %42 : vector<1x10xf32> to vector<2x10xf32>
    %44 = arith.addf %40, %43 : vector<2x10xf32>
    %45 = vector.extract_strided_slice %8 {offsets = [0, 256], sizes = [2, 128], strides = [1, 1]} : vector<2x512xbf16> to vector<2x128xbf16>
    %c2 = arith.constant 2 : index
    %c0_35 = arith.constant 0 : index
    %c0_36 = arith.constant 0 : index
    %46 = vector.load %arg4[%c2, %c0_35, %c0_36] : memref<4x128x84xbf16, #tpu.memory_space<vmem>>, vector<1x128x84xbf16>
    %47 = vector.shape_cast %46 : vector<1x128x84xbf16> to vector<128x84xbf16>
    %cst_37 = arith.constant dense<0.000000e+00> : vector<2x84xf32>
    %48 = tpu.matmul %45, %47, %cst_37 {dimension_numbers = #tpu.dot_dimension_numbers<[1], [0], [0], [1], [0, 0, 1, 1], [], []>} : vector<2x128xbf16>, vector<128x84xbf16>, vector<2x84xf32> -> vector<2x84xf32>
    %c2_38 = arith.constant 2 : index
    %c0_39 = arith.constant 0 : index
    %c0_40 = arith.constant 0 : index
    %49 = vector.load %arg5[%c2_38, %c0_39, %c0_40] : memref<4x1x84xf32, #tpu.memory_space<vmem>>, vector<1x1x84xf32>
    %50 = vector.shape_cast %49 : vector<1x1x84xf32> to vector<1x84xf32>
    %51 = vector.broadcast %50 : vector<1x84xf32> to vector<2x84xf32>
    %52 = arith.addf %48, %51 : vector<2x84xf32>
    %cst_41 = arith.constant 0.000000e+00 : f32
    %53 = vector.broadcast %cst_41 : f32 to vector<2x84xf32>
    %54 = arith.maximumf %52, %53 : vector<2x84xf32>
    %55 = arith.truncf %54 : vector<2x84xf32> to vector<2x84xbf16>
    %c2_42 = arith.constant 2 : index
    %c0_43 = arith.constant 0 : index
    %c0_44 = arith.constant 0 : index
    %56 = vector.load %arg6[%c2_42, %c0_43, %c0_44] : memref<4x84x10xbf16, #tpu.memory_space<vmem>>, vector<1x84x10xbf16>
    %57 = vector.shape_cast %56 : vector<1x84x10xbf16> to vector<84x10xbf16>
    %cst_45 = arith.constant dense<0.000000e+00> : vector<2x10xf32>
    %58 = tpu.matmul %55, %57, %cst_45 {dimension_numbers = #tpu.dot_dimension_numbers<[1], [0], [0], [1], [0, 0, 1, 1], [], []>} : vector<2x84xbf16>, vector<84x10xbf16>, vector<2x10xf32> -> vector<2x10xf32>
    %c2_46 = arith.constant 2 : index
    %c0_47 = arith.constant 0 : index
    %c0_48 = arith.constant 0 : index
    %59 = vector.load %arg7[%c2_46, %c0_47, %c0_48] : memref<4x1x10xf32, #tpu.memory_space<vmem>>, vector<1x1x10xf32>
    %60 = vector.shape_cast %59 : vector<1x1x10xf32> to vector<1x10xf32>
    %61 = vector.broadcast %60 : vector<1x10xf32> to vector<2x10xf32>
    %62 = arith.addf %58, %61 : vector<2x10xf32>
    %63 = vector.extract_strided_slice %8 {offsets = [0, 384], sizes = [2, 128], strides = [1, 1]} : vector<2x512xbf16> to vector<2x128xbf16>
    %c3 = arith.constant 3 : index
    %c0_49 = arith.constant 0 : index
    %c0_50 = arith.constant 0 : index
    %64 = vector.load %arg4[%c3, %c0_49, %c0_50] : memref<4x128x84xbf16, #tpu.memory_space<vmem>>, vector<1x128x84xbf16>
    %65 = vector.shape_cast %64 : vector<1x128x84xbf16> to vector<128x84xbf16>
    %cst_51 = arith.constant dense<0.000000e+00> : vector<2x84xf32>
    %66 = tpu.matmul %63, %65, %cst_51 {dimension_numbers = #tpu.dot_dimension_numbers<[1], [0], [0], [1], [0, 0, 1, 1], [], []>} : vector<2x128xbf16>, vector<128x84xbf16>, vector<2x84xf32> -> vector<2x84xf32>
    %c3_52 = arith.constant 3 : index
    %c0_53 = arith.constant 0 : index
    %c0_54 = arith.constant 0 : index
    %67 = vector.load %arg5[%c3_52, %c0_53, %c0_54] : memref<4x1x84xf32, #tpu.memory_space<vmem>>, vector<1x1x84xf32>
    %68 = vector.shape_cast %67 : vector<1x1x84xf32> to vector<1x84xf32>
    %69 = vector.broadcast %68 : vector<1x84xf32> to vector<2x84xf32>
    %70 = arith.addf %66, %69 : vector<2x84xf32>
    %cst_55 = arith.constant 0.000000e+00 : f32
    %71 = vector.broadcast %cst_55 : f32 to vector<2x84xf32>
    %72 = arith.maximumf %70, %71 : vector<2x84xf32>
    %73 = arith.truncf %72 : vector<2x84xf32> to vector<2x84xbf16>
    %c3_56 = arith.constant 3 : index
    %c0_57 = arith.constant 0 : index
    %c0_58 = arith.constant 0 : index
    %74 = vector.load %arg6[%c3_56, %c0_57, %c0_58] : memref<4x84x10xbf16, #tpu.memory_space<vmem>>, vector<1x84x10xbf16>
    %75 = vector.shape_cast %74 : vector<1x84x10xbf16> to vector<84x10xbf16>
    %cst_59 = arith.constant dense<0.000000e+00> : vector<2x10xf32>
    %76 = tpu.matmul %73, %75, %cst_59 {dimension_numbers = #tpu.dot_dimension_numbers<[1], [0], [0], [1], [0, 0, 1, 1], [], []>} : vector<2x84xbf16>, vector<84x10xbf16>, vector<2x10xf32> -> vector<2x10xf32>
    %c3_60 = arith.constant 3 : index
    %c0_61 = arith.constant 0 : index
    %c0_62 = arith.constant 0 : index
    %77 = vector.load %arg7[%c3_60, %c0_61, %c0_62] : memref<4x1x10xf32, #tpu.memory_space<vmem>>, vector<1x1x10xf32>
    %78 = vector.shape_cast %77 : vector<1x1x10xf32> to vector<1x10xf32>
    %79 = vector.broadcast %78 : vector<1x10xf32> to vector<2x10xf32>
    %80 = arith.addf %76, %79 : vector<2x10xf32>
    %81 = tpu.concatenate %26, %44, %62, %80 in 1 : vector<2x10xf32>, vector<2x10xf32>, vector<2x10xf32>, vector<2x10xf32> -> vector<2x40xf32>
    %c0_63 = arith.constant 0 : index
    %c0_64 = arith.constant 0 : index
    %c0_65 = arith.constant 0 : index
    %82 = vector.load %arg8[%c0_63, %c0_64, %c0_65] : memref<1x2x40xf32, #tpu.memory_space<vmem>>, vector<1x2x40xf32>
    %83 = vector.shape_cast %82 : vector<1x2x40xf32> to vector<2x40xf32>
    %84 = vector.shape_cast %81 : vector<2x40xf32> to vector<1x2x40xf32>
    tpu.vector_store %arg8[%c0_63, %c0_64, %c0_65], %84 {strides = array<i32>} : memref<1x2x40xf32, #tpu.memory_space<vmem>>, vector<1x2x40xf32>,
    return
  }
  func.func @transform_0(%arg0: i32) -> (i32, i32) {
    %c0_i32 = arith.constant 0 : i32
    %c0_i32_0 = arith.constant 0 : i32
    %c0_i32_1 = arith.constant 0 : i32
    return %c0_i32, %c0_i32_0 : i32, i32
  }
  func.func @transform_1(%arg0: i32) -> (i32, i32) {
    %c0_i32 = arith.constant 0 : i32
    %c0_i32_0 = arith.constant 0 : i32
    return %c0_i32, %arg0 : i32, i32
  }
  func.func @transform_2(%arg0: i32) -> (i32, i32) {
    %c0_i32 = arith.constant 0 : i32
    %c0_i32_0 = arith.constant 0 : i32
    return %c0_i32, %arg0 : i32, i32
  }
  func.func @transform_3(%arg0: i32) -> (i32, i32, i32) {
    %c0_i32 = arith.constant 0 : i32
    %c0_i32_0 = arith.constant 0 : i32
    %c0_i32_1 = arith.constant 0 : i32
    return %arg0, %c0_i32, %c0_i32_0 : i32, i32, i32
  }
  func.func @transform_4(%arg0: i32) -> (i32, i32, i32) {
    %c0_i32 = arith.constant 0 : i32
    %c0_i32_0 = arith.constant 0 : i32
    %c0_i32_1 = arith.constant 0 : i32
    return %arg0, %c0_i32, %c0_i32_0 : i32, i32, i32
  }
  func.func @transform_5(%arg0: i32) -> (i32, i32, i32) {
    %c0_i32 = arith.constant 0 : i32
    %c0_i32_0 = arith.constant 0 : i32
    %c0_i32_1 = arith.constant 0 : i32
    return %arg0, %c0_i32, %c0_i32_0 : i32, i32, i32
  }
  func.func @transform_6(%arg0: i32) -> (i32, i32, i32) {
    %c0_i32 = arith.constant 0 : i32
    %c0_i32_0 = arith.constant 0 : i32
    %c0_i32_1 = arith.constant 0 : i32
    return %arg0, %c0_i32, %c0_i32_0 : i32, i32, i32
  }
  func.func @transform_7(%arg0: i32) -> (i32, i32, i32) {
    %c0_i32 = arith.constant 0 : i32
    %c0_i32_0 = arith.constant 0 : i32
    %c0_i32_1 = arith.constant 0 : i32
    return %arg0, %c0_i32, %c0_i32_0 : i32, i32, i32
  }
}

</mosaic_0001>

<bundles_post_ra>
// kernel: combined_forward.1
= control target key start
LH: loop header
LB: loop body
LE: loop exit
PB: predicated region body
PF: predicated region fallthrough
CT: control target
= control target key end

     0   :  { %12 = vsyncpa [#allocation3], 0  ;;  %s2052_s24 = smov [#allocation2]   ;;  %s2600_s0 = inlined_call_operand.vmem [shape: bf16[2,256], index: 0, kind: input, shape index: {}]   ;;  %s2601_s1 = inlined_call_operand.vmem [shape: bf16[256,512], index: 1, kind: input, shape index: {}]   ;;  %s2602_s2 = inlined_call_operand.vmem [shape: f32[1,512], index: 2, kind: input, shape index: {}]   ;;  %s2603_s3 = inlined_call_operand.vmem [shape: bf16[4,128,84], index: 3, kind: input, shape index: {}]   ;;  %s2604_s4 = inlined_call_operand.vmem [shape: f32[4,1,84], index: 4, kind: input, shape index: {}]   ;;  %s2605_s5 = inlined_call_operand.vmem [shape: bf16[4,84,10], index: 5, kind: input, shape index: {}]   ;;  %s2606_s6 = inlined_call_operand.hbm [shape: f32[4,1,10], index: 6, kind: input, shape index: {}]   ;;  %s2607_s7 = inlined_call_operand.vmem [shape: f32[1,2,40], index: 7, kind: output, shape index: {}]  }
   0x1   :  { %s30_s25 = sshll.u32 %s2052_s24, 4  ;;  %s2028_s28 = scalar_lea.hbm %s2606_s6, 64  ;;  %s31_s25 = int_to_ptr.vmem [resolvable:$true] %s30_s25 }
   0x2   :  { %p2029_p0 = scmp.ne.s32.totalorder %s2606_s6, %s2028_s28  ;;  %p2032_p1 = scmp.lt.u32.totalorder %s2028_s28, %s2606_s6 }
   0x4   :  { %p2034_p2 = pnand %p2032_p1, %p2029_p0 }
   0x6   :  { %2037 = shalt.err (!%p2034_p2)
}
   0x7   :  { %s2038_s10 = scalar_lea.vmem %s31_s25, 64  ;;  %p2043_p4 = scmp.lt.s32.totalorder %s31_s25, %s31_s25 }
   0x8   :  { %p2039_p3 = scmp.ne.s32.totalorder %s31_s25, %s2038_s10  ;;  %p2044_p5 = scmp.lt.s32.totalorder %s2038_s10, %s2038_s10 }
   0xa   :  { %p2045_p6 = por %p2044_p5, %p2043_p4 }
   0xc   :  { %p2046_p7 = pnand %p2045_p6, %p2039_p3 }
   0xe   :  { %2049 = shalt.err (!%p2046_p7)
}
   0xf   :  { %s2053_s11 = smov 16   ;;  %s2054_s12 = smov 1  }
  0x10   :  { %36 = dma.hbm_to_vmem [thread:$0]  %s2606_s6, 64, %s31_s25, [#allocation3], %s2053_s11, %s2053_s11, %s2054_s12  }
  0x11   :  { %2050 = dma.done.wait [#allocation3], 64  }
  0x12   :  { %2051 = vsyncadd [#allocation3], 4294967232  ;;  %v1876_v0 = vld [vmem:[%s2601_s1 + $0x4] ss:$16 sps:$4 sm:$0xff]   ;;  %v1878_v1 = vld [vmem:[%s2601_s1] ss:$16 sps:$4 sm:$0xff]   ;;  %v108_v9 = vlaneseq }
  0x13   :  { %473 = vmatprep.subr.bf16.mxu0 %v1876_v0  ;;  %v1879_v2 = vld [vmem:[%s2601_s1 + $0x24] ss:$16 sps:$4 sm:$0xff]   ;;  %v1881_v3 = vld [vmem:[%s2601_s1 + $0x20] ss:$16 sps:$4 sm:$0xff]   ;;  %v2055_v10 = vmov 1966171168  }
  0x14   :  { %474 = vmatpush1.bf16.msra.mxu0 %v1878_v1  ;;  %v1882_v4 = vld [vmem:[%s2601_s1 + $0x44] ss:$16 sps:$4 sm:$0xff]   ;;  %v1884_v5 = vld [vmem:[%s2601_s1 + $0x40] ss:$16 sps:$4 sm:$0xff]   ;;  %v138_v11 = vunpack.c.l.s4 %v2055_v10  ;;  %v2146_v14 = vshrl.u32 %v108_v9, 7  ;;  %v2056_v43 = vmov 0.0  }
  0x15   :  { %475 = vmatprep.subr.bf16.mxu0 %v1879_v2  ;;  %v1885_v6 = vld [vmem:[%s2601_s1 + $0x64] ss:$16 sps:$4 sm:$0xff]   ;;  %v1887_v7 = vld [vmem:[%s2601_s1 + $0x60] ss:$16 sps:$4 sm:$0xff]   ;;  %v1925_v44 = vld [vmem:[%s2603_s3 + $0x8] sm:$0xff]   ;;  %vm2057_vm0 = vmmov 0  }
  0x16   :  { %v1888_v8 = vld [vmem:[%s2601_s1 + $0x84] ss:$16 sps:$4 sm:$0xff]   ;;  %v1890_v12 = vld [vmem:[%s2601_s1 + $0x80] ss:$16 sps:$4 sm:$0xff]   ;;  %v139_v15 = vunpack.c.0.s8 %v138_v11  ;;  %v1927_v46 = vld [vmem:[%s2603_s3 + $0x18] sm:$0xff]   ;;  %vm731_vm1 = vcmask 1041408  }
  0x17   :  { %v1891_v13 = vld [vmem:[%s2601_s1 + $0xa4] ss:$16 sps:$4 sm:$0xff]   ;;  %v1893_v16 = vld [vmem:[%s2601_s1 + $0xa0] ss:$16 sps:$4 sm:$0xff]   ;;  %v1929_v48 = vld [vmem:[%s2603_s3 + $0x28] sm:$0xff]   ;;  %vm727_vm2 = vcmask 687104  }
  0x18   :  { %476 = vmatpush1.bf16.msra.mxu0 %v1881_v3  ;;  %v1894_v17 = vld [vmem:[%s2601_s1 + $0xc4] ss:$16 sps:$4 sm:$0xff]   ;;  %v142_v18 = vsub.s32 %v139_v15, %v2146_v14  ;;  %v1442_v19 = vld.sshfl [vmem:[%s2600_s0] sm:$0x11 pattern:$0x75316420] }
  0x19   :  { %477 = vmatprep.subr.bf16.mxu0 %v1882_v4  ;;  %v136_v20 = vcombine.high %v1442_v19, %v1442_v19  ;;  %v1896_v21 = vld [vmem:[%s2601_s1 + $0xc0] ss:$16 sps:$4 sm:$0xff]   ;;  %v1897_v22 = vld [vmem:[%s2601_s1 + $0xe4] ss:$16 sps:$4 sm:$0xff]   ;;  %v1931_v50 = vld [vmem:[%s2603_s3 + $0x38] sm:$0xff]   ;;  %s2058_s28 = smov 10  }
  0x1a   :  { %v1899_v24 = vld [vmem:[%s2601_s1 + $0xe0] ss:$16 sps:$4 sm:$0xff]   ;;  %v1900_v25 = vld [vmem:[%s2601_s1 + $0x104] ss:$16 sps:$4 sm:$0xff]   ;;  %v2218_v42 = vrot.slane %v1442_v19, %v142_v18  ;;  %v1932_v51 = vld [vmem:[%s2601_s1 + $0xc] ss:$16 sps:$4 sm:$0xff]  }
  0x1b   :  { %v150_v23 = vrot.slane %v136_v20, %v142_v18  ;;  %v1902_v26 = vld [vmem:[%s2601_s1 + $0x100] ss:$16 sps:$4 sm:$0xff]   ;;  %v1903_v27 = vld [vmem:[%s2601_s1 + $0x124] ss:$16 sps:$4 sm:$0xff]   ;;  %v1934_v52 = vld [vmem:[%s2601_s1 + $0x8] ss:$16 sps:$4 sm:$0xff]   ;;  %514 = vmatprep.subr.bf16.mxu1 %v1932_v51 }
  0x1c   :  { %478 = vmatpush1.bf16.msra.mxu0 %v1884_v5  ;;  %v1905_v28 = vld [vmem:[%s2601_s1 + $0x120] ss:$16 sps:$4 sm:$0xff]   ;;  %v1906_v29 = vld [vmem:[%s2601_s1 + $0x144] ss:$16 sps:$4 sm:$0xff]   ;;  %v1935_v53 = vld [vmem:[%s2601_s1 + $0x2c] ss:$16 sps:$4 sm:$0xff]   ;;  %515 = vmatpush1.bf16.msra.mxu1 %v1934_v52 }
  0x1d   :  { %479 = vmatprep.subr.bf16.mxu0 %v1885_v6  ;;  %505 = vmatprep.mubr.bf16.mxu0 %v150_v23  ;;  %v1908_v30 = vld [vmem:[%s2601_s1 + $0x140] ss:$16 sps:$4 sm:$0xff]   ;;  %v1909_v31 = vld [vmem:[%s2601_s1 + $0x164] ss:$16 sps:$4 sm:$0xff]   ;;  %v1937_v54 = vld [vmem:[%s2601_s1 + $0x28] ss:$16 sps:$4 sm:$0xff]  }
  0x1e   :  { %546 = vmatprep.mubr.bf16.mxu1 %v150_v23  ;;  %v1911_v32 = vld [vmem:[%s2601_s1 + $0x160] ss:$16 sps:$4 sm:$0xff]   ;;  %v1912_v33 = vld [vmem:[%s2601_s1 + $0x184] ss:$16 sps:$4 sm:$0xff]   ;;  %516 = vmatprep.subr.bf16.mxu1 %v1935_v53  ;;  %v1938_v55 = vld [vmem:[%s2601_s1 + $0x4c] ss:$16 sps:$4 sm:$0xff]  }
  0x1f   :  { %v1914_v34 = vld [vmem:[%s2601_s1 + $0x180] ss:$16 sps:$4 sm:$0xff]   ;;  %v1915_v35 = vld [vmem:[%s2601_s1 + $0x1a4] ss:$16 sps:$4 sm:$0xff]   ;;  %v1940_v56 = vld [vmem:[%s2601_s1 + $0x48] ss:$16 sps:$4 sm:$0xff]  }
  0x20   :  { %480 = vmatpush1.bf16.msra.mxu0 %v1887_v7  ;;  %v1917_v36 = vld [vmem:[%s2601_s1 + $0x1a0] ss:$16 sps:$4 sm:$0xff]   ;;  %v1918_v37 = vld [vmem:[%s2601_s1 + $0x1c4] ss:$16 sps:$4 sm:$0xff]   ;;  %517 = vmatpush1.bf16.msra.mxu1 %v1937_v54  ;;  %v1941_v57 = vld [vmem:[%s2601_s1 + $0x6c] ss:$16 sps:$4 sm:$0xff]  }
  0x21   :  { %481 = vmatprep.subr.bf16.mxu0 %v1888_v8  ;;  %v1920_v38 = vld [vmem:[%s2601_s1 + $0x1c0] ss:$16 sps:$4 sm:$0xff]   ;;  %v1921_v39 = vld [vmem:[%s2601_s1 + $0x1e4] ss:$16 sps:$4 sm:$0xff]   ;;  %518 = vmatprep.subr.bf16.mxu1 %v1938_v55  ;;  %v1943_v58 = vld [vmem:[%s2601_s1 + $0x68] ss:$16 sps:$4 sm:$0xff]  }
  0x22   :  { %v1923_v40 = vld [vmem:[%s2601_s1 + $0x1e0] ss:$16 sps:$4 sm:$0xff]   ;;  %v1944_v59 = vld [vmem:[%s2601_s1 + $0x8c] ss:$16 sps:$4 sm:$0xff]   ;;  %v1946_v60 = vld [vmem:[%s2601_s1 + $0x88] ss:$16 sps:$4 sm:$0xff]  }
  0x23   :  { %v1924_v41 = vld [vmem:[%s2603_s3] sm:$0xff]   ;;  %v1926_v45 = vld [vmem:[%s2603_s3 + $0x10] sm:$0xff]   ;;  %v1947_v61 = vld [vmem:[%s2601_s1 + $0xac] ss:$16 sps:$4 sm:$0xff]   ;;  %v114_v55 = vsub.s32 1, %v2146_v14  ;;  %s2059_s8 = smov 20  }
  0x24   :  { %482 = vmatpush1.bf16.msra.mxu0 %v1890_v12  ;;  %v1928_v47 = vld [vmem:[%s2603_s3 + $0x20] sm:$0xff]   ;;  %v1930_v49 = vld [vmem:[%s2603_s3 + $0x30] sm:$0xff]   ;;  %519 = vmatpush1.bf16.msra.mxu1 %v1940_v56  ;;  %v1949_v62 = vld [vmem:[%s2601_s1 + $0xa8] ss:$16 sps:$4 sm:$0xff]   ;;  %vm1429_vm3 = vcmask 80896   ;;  %vm1431_vm4 = vcmask 162816  }
  0x25   :  { %483 = vmatprep.subr.bf16.mxu0 %v1891_v13  ;;  %520 = vmatprep.subr.bf16.mxu1 %v1941_v57  ;;  %v1950_v63 = vld [vmem:[%s2601_s1 + $0xcc] ss:$16 sps:$4 sm:$0xff]   ;;  %v1952_v0 = vld [vmem:[%s2601_s1 + $0xc8] ss:$16 sps:$4 sm:$0xff]   ;;  %v1980_v20 = vld [vmem:[%s2605_s5] sm:$0xff]   ;;  %vm1433_vm5 = vcmask 244736  }
  0x26   :  { %v1953_v1 = vld [vmem:[%s2601_s1 + $0xec] ss:$16 sps:$4 sm:$0xff]   ;;  %v1955_v2 = vld [vmem:[%s2601_s1 + $0xe8] ss:$16 sps:$4 sm:$0xff]   ;;  %v1988_v52 = vld [vmem:[%s2603_s3 + $0x50] sm:$0xff]   ;;  %vm1435_vm6 = vcmask 320512  }
  0x27   :  { %v1956_v3 = vld [vmem:[%s2601_s1 + $0x10c] ss:$16 sps:$4 sm:$0xff]   ;;  %v1958_v4 = vld [vmem:[%s2601_s1 + $0x108] ss:$16 sps:$4 sm:$0xff]   ;;  %v1990_v54 = vld [vmem:[%s2603_s3 + $0x60] sm:$0xff]  }
  0x28   :  { %484 = vmatpush1.bf16.msra.mxu0 %v1893_v16  ;;  %521 = vmatpush1.bf16.msra.mxu1 %v1943_v58  ;;  %v1959_v5 = vld [vmem:[%s2601_s1 + $0x12c] ss:$16 sps:$4 sm:$0xff]   ;;  %v1961_v6 = vld [vmem:[%s2601_s1 + $0x128] ss:$16 sps:$4 sm:$0xff]   ;;  %v1992_v58 = vld [vmem:[%s2603_s3 + $0x70] sm:$0xff]  }
  0x29   :  { %485 = vmatprep.subr.bf16.mxu0 %v1894_v17  ;;  %522 = vmatprep.subr.bf16.mxu1 %v1944_v59  ;;  %v1962_v7 = vld [vmem:[%s2601_s1 + $0x14c] ss:$16 sps:$4 sm:$0xff]   ;;  %v1964_v8 = vld [vmem:[%s2601_s1 + $0x148] ss:$16 sps:$4 sm:$0xff]  }
  0x2a   :  { %v1965_v9 = vld [vmem:[%s2601_s1 + $0x16c] ss:$16 sps:$4 sm:$0xff]   ;;  %v1967_v10 = vld [vmem:[%s2601_s1 + $0x168] ss:$16 sps:$4 sm:$0xff]  }
  0x2b   :  { %v1968_v11 = vld [vmem:[%s2601_s1 + $0x18c] ss:$16 sps:$4 sm:$0xff]   ;;  %v1970_v12 = vld [vmem:[%s2601_s1 + $0x188] ss:$16 sps:$4 sm:$0xff]  }
  0x2c   :  { %486 = vmatpush1.bf16.msra.mxu0 %v1896_v21  ;;  %523 = vmatpush1.bf16.msra.mxu1 %v1946_v60  ;;  %v1971_v13 = vld [vmem:[%s2601_s1 + $0x1ac] ss:$16 sps:$4 sm:$0xff]   ;;  %v1973_v15 = vld [vmem:[%s2601_s1 + $0x1a8] ss:$16 sps:$4 sm:$0xff]  }
  0x2d   :  { %487 = vmatprep.subr.bf16.mxu0 %v1897_v22  ;;  %524 = vmatprep.subr.bf16.mxu1 %v1947_v61  ;;  %v1974_v16 = vld [vmem:[%s2601_s1 + $0x1cc] ss:$16 sps:$4 sm:$0xff]   ;;  %v1976_v17 = vld [vmem:[%s2601_s1 + $0x1c8] ss:$16 sps:$4 sm:$0xff]   ;;  %v1982_v22 = vld [vmem:[%s2605_s5 + $0x10] sm:$0xff]  }
  0x2e   :  { %v1977_v18 = vld [vmem:[%s2601_s1 + $0x1ec] ss:$16 sps:$4 sm:$0xff]   ;;  %v1979_v19 = vld [vmem:[%s2601_s1 + $0x1e8] ss:$16 sps:$4 sm:$0xff]  }
  0x2f   :  { %v1981_v21 = vld [vmem:[%s2605_s5 + $0x8] sm:$0xff]   ;;  %v1983_v23 = vld [vmem:[%s2605_s5 + $0x18] sm:$0xff]  }
  0x30   :  { %488 = vmatpush1.bf16.msra.mxu0 %v1899_v24  ;;  %525 = vmatpush1.bf16.msra.mxu1 %v1949_v62  ;;  %v1984_v24 = vld [vmem:[%s2605_s5 + $0x20] sm:$0xff]   ;;  %v1987_v51 = vld [vmem:[%s2603_s3 + $0x48] sm:$0xff]   ;;  %v1989_v53 = vld [vmem:[%s2603_s3 + $0x58] sm:$0xff]  }
  0x31   :  { %489 = vmatprep.subr.bf16.mxu0 %v1900_v25  ;;  %526 = vmatprep.subr.bf16.mxu1 %v1950_v63  ;;  %v110_v25 = vsub.s32 0, %v2146_v14  ;;  %v1991_v56 = vld [vmem:[%s2603_s3 + $0x68] sm:$0xff]   ;;  %v1993_v60 = vld [vmem:[%s2603_s3 + $0x78] sm:$0xff]  }
  0x32   :  { %v1994_v63 = vld [vmem:[%s2605_s5 + $0x2c] sm:$0xff]  }
  0x34   :  { %490 = vmatpush1.bf16.msra.mxu0 %v1902_v26  ;;  %527 = vmatpush1.bf16.msra.mxu1 %v1952_v0  ;;  %v2377_v26 = vld [vmem:[%s2602_s2] sm:$0xf]  ;;  %v1995_v0 = vld [vmem:[%s2605_s5 + $0x34] sm:$0xff]  }
  0x35   :  { %491 = vmatprep.subr.bf16.mxu0 %v1903_v27  ;;  %528 = vmatprep.subr.bf16.mxu1 %v1953_v1  ;;  %v111_v27 = vrot.slane %v2377_v26, %v110_v25  ;;  %v115_v57 = vrot.slane %v2377_v26, %v114_v55  ;;  %v1996_v1 = vld [vmem:[%s2605_s5 + $0x3c] sm:$0xff]   ;;  %v2005_v25 = vld [vmem:[%s2603_s3 + $0xa8] sm:$0xff]  }
  0x36   :  { %v2014_v55 = vld [vmem:[%s2603_s3 + $0xc0] sm:$0xff]  }
  0x38   :  { %492 = vmatpush1.bf16.msra.mxu0 %v1905_v28  ;;  %529 = vmatpush1.bf16.msra.mxu1 %v1955_v2  ;;  %v1997_v2 = vld [vmem:[%s2605_s5 + $0x44] sm:$0xff]  }
  0x39   :  { %493 = vmatprep.subr.bf16.mxu0 %v1906_v29  ;;  %530 = vmatprep.subr.bf16.mxu1 %v1956_v3  ;;  %v1998_v3 = vld [vmem:[%s2605_s5 + $0x4c] sm:$0xff]  }
  0x3c   :  { %494 = vmatpush1.bf16.msra.mxu0 %v1908_v30  ;;  %531 = vmatpush1.bf16.msra.mxu1 %v1958_v4  ;;  %v1999_v4 = vld [vmem:[%s2605_s5 + $0x54] ss:$0 sps:$4 sm:$0x33]  }
  0x3d   :  { %495 = vmatprep.subr.bf16.mxu0 %v1909_v31  ;;  %532 = vmatprep.subr.bf16.mxu1 %v1959_v5  ;;  %v947_v5 = vsel %vm731_vm1, %v1999_v4, 0  ;;  %v2024_v4 = vld [vmem:[%s2605_s5 + $0x94] sm:$0xff]  }
  0x40   :  { %496 = vmatpush1.bf16.msra.mxu0 %v1911_v32  ;;  %533 = vmatpush1.bf16.msra.mxu1 %v1961_v6 }
  0x41   :  { %497 = vmatprep.subr.bf16.mxu0 %v1912_v33  ;;  %534 = vmatprep.subr.bf16.mxu1 %v1962_v7 }
  0x44   :  { %498 = vmatpush1.bf16.msra.mxu0 %v1914_v34  ;;  %535 = vmatpush1.bf16.msra.mxu1 %v1964_v8 }
  0x45   :  { %499 = vmatprep.subr.bf16.mxu0 %v1915_v35  ;;  %536 = vmatprep.subr.bf16.mxu1 %v1965_v9  ;;  %v1985_v35 = vld [vmem:[%s2605_s5 + $0x28] ss:$0 sps:$4 sm:$0x33]  }
  0x48   :  { %500 = vmatpush1.bf16.msra.mxu0 %v1917_v36  ;;  %537 = vmatpush1.bf16.msra.mxu1 %v1967_v10  ;;  %v733_v36 = vsel %vm731_vm1, %v1985_v35, 0  ;;  %v1541_v10 = vld [vmem:[%s2604_s4 + $0x1] ss:$0 sm:$0xff]  ;;  %v2010_v35 = vld [vmem:[%s2605_s5 + $0x68] sm:$0xff]  }
  0x49   :  { %501 = vmatprep.subr.bf16.mxu0 %v1918_v37  ;;  %538 = vmatprep.subr.bf16.mxu1 %v1968_v11 }
  0x4c   :  { %502 = vmatpush1.bf16.msra.mxu0 %v1920_v38  ;;  %539 = vmatpush1.bf16.msra.mxu1 %v1970_v12 }
  0x4d   :  { %503 = vmatprep.subr.bf16.mxu0 %v1921_v39  ;;  %540 = vmatprep.subr.bf16.mxu1 %v1971_v13 }
  0x50   :  { %504 = vmatpush1.bf16.msra.mxu0 %v1923_v40  ;;  %541 = vmatpush1.bf16.msra.mxu1 %v1973_v15 }
  0x51   :  { %1723 = vmatprep.subr.bf16.mxu0 %v2056_v43  ;;  %542 = vmatprep.subr.bf16.mxu1 %v1974_v16 }
  0x53   :  { %506 = vmatmul.mubr.bf16.vlgmr.msra.gmra.mrb[0].mxu0 %v2218_v42 }
  0x54   :  { %1724 = vmatpush3.bf16.msra.mxu0 %v1924_v41  ;;  %1739 = vmatprep.mubr.msk.bf16.mxu0 %vm2057_vm0, %v2056_v43  ;;  %v1507_v41 = vld [vmem:[%s2604_s4] ss:$0 sm:$0xff] }
  0x55   :  { %1725 = vmatprep.subr.bf16.mxu0 %v2056_v43  ;;  %543 = vmatpush1.bf16.msra.mxu1 %v1976_v17 }
  0x56   :  { %544 = vmatprep.subr.bf16.mxu1 %v1977_v18  ;;  %v2000_v18 = vld [vmem:[%s2603_s3 + $0x80] sm:$0xff]  }
  0x58   :  { %1726 = vmatpush3.bf16.msra.mxu0 %v1925_v44 }
  0x59   :  { %1727 = vmatprep.subr.bf16.mxu0 %v2056_v43  ;;  %545 = vmatpush1.bf16.msra.mxu1 %v1979_v19 }
  0x5a   :  { %1743 = vmatprep.subr.bf16.mxu1 %v2056_v43 }
  0x5c   :  { %1728 = vmatpush3.bf16.msra.mxu0 %v1926_v45  ;;  %547 = vmatmul.mubr.bf16.vlgmr.msra.gmra.mrb[0].mxu1 %v2218_v42 }
  0x5d   :  { %1729 = vmatprep.subr.bf16.mxu0 %v2056_v43  ;;  %1744 = vmatpush3.bf16.msra.mxu1 %v1980_v20  ;;  %v2001_v20 = vld [vmem:[%s2603_s3 + $0x88] sm:$0xff]  }
  0x5e   :  { %1755 = vmatprep.mubr.msk.bf16.mxu1 %vm2057_vm0, %v2056_v43  ;;  %1745 = vmatprep.subr.bf16.mxu1 %v2056_v43 }
  0x60   :  { %1730 = vmatpush3.bf16.msra.mxu0 %v1927_v46 }
  0x61   :  { %1731 = vmatprep.subr.bf16.mxu0 %v2056_v43  ;;  %1746 = vmatpush3.bf16.msra.mxu1 %v1981_v21  ;;  %v2002_v21 = vld [vmem:[%s2603_s3 + $0x90] sm:$0xff]  }
  0x62   :  { %1747 = vmatprep.subr.bf16.mxu1 %v2056_v43 }
  0x64   :  { %1732 = vmatpush3.bf16.msra.mxu0 %v1928_v47 }
  0x65   :  { %1733 = vmatprep.subr.bf16.mxu0 %v2056_v43  ;;  %1748 = vmatpush3.bf16.msra.mxu1 %v1982_v22  ;;  %v2003_v22 = vld [vmem:[%s2603_s3 + $0x98] sm:$0xff]  }
  0x66   :  { %1749 = vmatprep.subr.bf16.mxu1 %v2056_v43 }
  0x68   :  { %1734 = vmatpush3.bf16.msra.mxu0 %v1929_v48 }
  0x69   :  { %1735 = vmatprep.subr.bf16.mxu0 %v2056_v43  ;;  %1750 = vmatpush3.bf16.msra.mxu1 %v1983_v23  ;;  %v2004_v23 = vld [vmem:[%s2603_s3 + $0xa0] sm:$0xff]  }
  0x6a   :  { %1751 = vmatprep.subr.bf16.mxu1 %v2056_v43 }
  0x6c   :  { %1736 = vmatpush3.bf16.msra.mxu0 %v1930_v49  ;;  %v1986_v49 = vld [vmem:[%s2603_s3 + $0x40] sm:$0xff]  }
  0x6d   :  { %1737 = vmatprep.subr.bf16.mxu0 %v2056_v43  ;;  %1752 = vmatpush3.bf16.msra.mxu1 %v1984_v24  ;;  %v118_v24 = vsub.s32 2, %v2146_v14 }
  0x6e   :  { %1753 = vmatprep.subr.bf16.mxu1 %v2056_v43 }
  0x70   :  { %1738 = vmatpush3.bf16.msra.mxu0 %v1931_v50 }
  0x71   :  { %1779 = vmatprep.subr.bf16.mxu0 %v2056_v43  ;;  %1754 = vmatpush3.bf16.msra.mxu1 %v733_v36  ;;  %v2011_v36 = vld [vmem:[%s2605_s5 + $0x70] sm:$0xff]  }
  0x72   :  { %1759 = vmatprep.subr.bf16.mxu1 %v2056_v43 }
 0x126   :  { %v507_v28 = vpop.f32.mrb[0].mxu0 }
 0x127   :  { %v508_v29 = vadd.f32 %v507_v28, %v111_v27  ;;  %v509_v30 = vpop.f32.mrb[1].mxu0  ;;  %v119_v27 = vrot.slane %v2377_v26, %v118_v24  ;;  %v2006_v28 = vld [vmem:[%s2603_s3 + $0xb0] sm:$0xff]   ;;  %v1651_v24 = vld [vmem:[#allocation2 + $0x3] ss:$0 sm:$0xff] }
 0x128   :  { %v511_v31 = vpop.f32.mrb[2].mxu0  ;;  %v510_v59 = vadd.f32 %v509_v30, %v115_v57  ;;  %v2007_v30 = vld [vmem:[%s2603_s3 + $0xb8] sm:$0xff]   ;;  %v2015_v57 = vld [vmem:[%s2603_s3 + $0xc8] sm:$0xff]  }
 0x129   :  { %v555_v32 = vmax.f32 %v508_v29, 0.0  ;;  %v512_v33 = vpop.f32.mrb[3].mxu0 }
 0x12a   :  { %v556_v61 = vmax.f32 %v510_v59, 0.0  ;;  %v2008_v33 = vld [vmem:[%s2605_s5 + $0x58] sm:$0xff]  }
 0x12b   :  { %v559_v34 = vpack.c.bf16 %v555_v32, %v555_v32  ;;  %v2017_v59 = vld [vmem:[%s2603_s3 + $0xd8] sm:$0xff]  }
 0x12c   :  { %v560_v62 = vpack.c.bf16 %v556_v61, %v556_v61  ;;  %v122_v61 = vsub.s32 3, %v2146_v14  ;;  %v2021_v14 = vld [vmem:[%s2603_s3 + $0xf8] sm:$0xff]  }
 0x12d   :  { %1740 = vmatmul.mubr.bf16.vlgmr.msra.gmra.mrb[4].mxu0 %v559_v34  ;;  %v2009_v34 = vld [vmem:[%s2605_s5 + $0x60] sm:$0xff]  }
 0x12e   :  { %1791 = vmatprep.mubr.msk.bf16.mxu0 %vm2057_vm0, %v2056_v43  ;;  %1780 = vmatpush3.bf16.msra.mxu0 %v1994_v63  ;;  %v123_v63 = vrot.slane %v2377_v26, %v122_v61 }
 0x12f   :  { %v2387_v37 = vpop.f32.mrb[0].mxu1  ;;  %1781 = vmatprep.subr.bf16.mxu0 %v2056_v43 }
 0x130   :  { %v2389_v38 = vpop.f32.mrb[1].mxu1  ;;  %v549_v29 = vadd.f32 %v2387_v37, %v119_v27  ;;  %v2012_v37 = vld [vmem:[%s2605_s5 + $0x78] sm:$0xff]  }
 0x131   :  { %v552_v39 = vpop.f32.mrb[2].mxu1 }
 0x132   :  { %v553_v40 = vpop.f32.mrb[3].mxu1  ;;  %1782 = vmatpush3.bf16.msra.mxu0 %v1995_v0  ;;  %v557_v31 = vmax.f32 %v549_v29, 0.0  ;;  %v2013_v39 = vld [vmem:[%s2605_s5 + $0x80] ss:$0 sps:$4 sm:$0x33]   ;;  %v2020_v0 = vld [vmem:[%s2603_s3 + $0xf0] sm:$0xff]  }
 0x133   :  { %1783 = vmatprep.subr.bf16.mxu0 %v2056_v43  ;;  %v1161_v40 = vsel %vm731_vm1, %v2013_v39, 0 }
 0x134   :  { %v561_v32 = vpack.c.bf16 %v557_v31, %v557_v31 }
 0x136   :  { %1784 = vmatpush3.bf16.msra.mxu0 %v1996_v1  ;;  %v551_v1 = vadd.f32 %v2389_v38, %v123_v63  ;;  %v2023_v38 = vld [vmem:[%s2605_s5 + $0x8c] sm:$0xff]  }
 0x137   :  { %1785 = vmatprep.subr.bf16.mxu0 %v2056_v43 }
 0x13a   :  { %1786 = vmatpush3.bf16.msra.mxu0 %v1997_v2  ;;  %v558_v2 = vmax.f32 %v551_v1, 0.0 }
 0x13b   :  { %1787 = vmatprep.subr.bf16.mxu0 %v2056_v43 }
 0x13c   :  { %v562_v26 = vpack.c.bf16 %v558_v2, %v558_v2 }
 0x13e   :  { %1788 = vmatpush3.bf16.msra.mxu0 %v1998_v3  ;;  %v2022_v3 = vld [vmem:[%s2605_s5 + $0x84] sm:$0xff]  }
 0x13f   :  { %1789 = vmatprep.subr.bf16.mxu0 %v2056_v43 }
 0x142   :  { %1790 = vmatpush3.bf16.msra.mxu0 %v947_v5  ;;  %v2025_v5 = vld [vmem:[%s2605_s5 + $0x9c] sm:$0xff]  }
 0x143   :  { %1795 = vmatprep.subr.bf16.mxu0 %v2056_v43 }
 0x200   :  { %v668_v42 = vpop.f32.mrb[4].mxu0 }
 0x201   :  { %v669_v44 = vadd.f32 %v1507_v41, %v668_v42  ;;  %v1741_v45 = vpop.f32.mrb[5].mxu0  ;;  %v1561_v41 = vld [vmem:[#allocation2 + $0x1] ss:$0 sm:$0xff] }
 0x202   :  { %v671_v46 = vpop.f32.mrb[6].mxu0 }
 0x203   :  { %v674_v47 = vmax.f32 %v669_v44, 0.0  ;;  %v1742_v48 = vpop.f32.mrb[7].mxu0 }
 0x204   :  { %v1586_v48 = vld [vmem:[%s2604_s4 + $0x2] ss:$0 sm:$0xff] }
 0x205   :  { %v675_v50 = vpack.c.bf16 %v674_v47, %v674_v47 }
 0x207   :  { %1756 = vmatmul.mubr.msk.bf16.vlgmr.msra.gmra.mrb[4].mxu1 %vm727_vm2, %v675_v50 }
 0x208   :  { %1760 = vmatpush3.bf16.msra.mxu1 %v1986_v49  ;;  %1775 = vmatprep.mubr.msk.bf16.mxu1 %vm2057_vm0, %v2056_v43 }
 0x209   :  { %1761 = vmatprep.subr.bf16.mxu1 %v2056_v43 }
 0x20c   :  { %1762 = vmatpush3.bf16.msra.mxu1 %v1987_v51 }
 0x20d   :  { %1763 = vmatprep.subr.bf16.mxu1 %v2056_v43 }
 0x210   :  { %1764 = vmatpush3.bf16.msra.mxu1 %v1988_v52 }
 0x211   :  { %1765 = vmatprep.subr.bf16.mxu1 %v2056_v43 }
 0x214   :  { %1766 = vmatpush3.bf16.msra.mxu1 %v1989_v53 }
 0x215   :  { %1767 = vmatprep.subr.bf16.mxu1 %v2056_v43 }
 0x218   :  { %1768 = vmatpush3.bf16.msra.mxu1 %v1990_v54 }
 0x219   :  { %1769 = vmatprep.subr.bf16.mxu1 %v2056_v43 }
 0x21c   :  { %1770 = vmatpush3.bf16.msra.mxu1 %v1991_v56 }
 0x21d   :  { %1771 = vmatprep.subr.bf16.mxu1 %v2056_v43 }
 0x220   :  { %1772 = vmatpush3.bf16.msra.mxu1 %v1992_v58  ;;  %v2016_v58 = vld [vmem:[%s2603_s3 + $0xd0] sm:$0xff]  }
 0x221   :  { %1773 = vmatprep.subr.bf16.mxu1 %v2056_v43 }
 0x224   :  { %1774 = vmatpush3.bf16.msra.mxu1 %v1993_v60  ;;  %v2018_v60 = vld [vmem:[%s2603_s3 + $0xe0] sm:$0xff]  }
 0x225   :  { %1815 = vmatprep.subr.bf16.mxu1 %v2056_v43 }
 0x227   :  { %1776 = vmatmul.mubr.bf16.vlgmr.msra.gmra.mrb[8].mxu1 %v560_v62  ;;  %v2019_v62 = vld [vmem:[%s2603_s3 + $0xe8] sm:$0xff]  }
 0x228   :  { %1827 = vmatprep.mubr.msk.bf16.mxu1 %vm2057_vm0, %v2056_v43  ;;  %1816 = vmatpush3.bf16.msra.mxu1 %v2008_v33 }
 0x229   :  { %1817 = vmatprep.subr.bf16.mxu1 %v2056_v43 }
 0x22c   :  { %1818 = vmatpush3.bf16.msra.mxu1 %v2009_v34 }
 0x22d   :  { %1819 = vmatprep.subr.bf16.mxu1 %v2056_v43 }
 0x230   :  { %1820 = vmatpush3.bf16.msra.mxu1 %v2010_v35 }
 0x231   :  { %1821 = vmatprep.subr.bf16.mxu1 %v2056_v43 }
 0x234   :  { %1822 = vmatpush3.bf16.msra.mxu1 %v2011_v36 }
 0x235   :  { %1823 = vmatprep.subr.bf16.mxu1 %v2056_v43 }
 0x238   :  { %1824 = vmatpush3.bf16.msra.mxu1 %v2012_v37 }
 0x239   :  { %1825 = vmatprep.subr.bf16.mxu1 %v2056_v43 }
 0x23c   :  { %1826 = vmatpush3.bf16.msra.mxu1 %v1161_v40 }
 0x23d   :  { %1831 = vmatprep.subr.bf16.mxu1 %v2056_v43 }
 0x2da   :  { %v2458_v6 = vpop.f32.mrb[4].mxu1 }
 0x2db   :  { %v1757_v7 = vpop.f32.mrb[5].mxu1 }
 0x2dc   :  { %v772_v8 = vpop.f32.mrb[6].mxu1  ;;  %v2026_v7 = vld [vmem:[%s2605_s5 + $0xa4] sm:$0xff]  }
 0x2dd   :  { %v1758_v9 = vpop.f32.mrb[7].mxu1  ;;  %v2027_v8 = vld [vmem:[%s2605_s5 + $0xac] ss:$0 sps:$4 sm:$0x33]   ;;  %s2060_s5 = smov 30  }
 0x2de   :  { %v1375_v9 = vsel %vm731_vm1, %v2027_v8, 0 }
 0x2fa   :  { %v882_v11 = vpop.f32.mrb[8].mxu1 }
 0x2fb   :  { %v883_v12 = vadd.f32 %v1541_v10, %v882_v11  ;;  %v1777_v13 = vpop.f32.mrb[9].mxu1  ;;  %v1606_v10 = vld [vmem:[#allocation2 + $0x2] ss:$0 sm:$0xff] }
 0x2fc   :  { %v885_v15 = vpop.f32.mrb[10].mxu1 }
 0x2fd   :  { %v888_v16 = vmax.f32 %v883_v12, 0.0  ;;  %v1778_v17 = vpop.f32.mrb[11].mxu1 }
 0x2fe   :  { %v1631_v17 = vld [vmem:[%s2604_s4 + $0x3] ss:$0 sm:$0xff] }
 0x2ff   :  { %v889_v19 = vpack.c.bf16 %v888_v16, %v888_v16 }
 0x301   :  { %1792 = vmatmul.mubr.msk.bf16.vlgmr.msra.gmra.mrb[8].mxu0 %vm727_vm2, %v889_v19 }
 0x302   :  { %1796 = vmatpush3.bf16.msra.mxu0 %v2000_v18  ;;  %1811 = vmatprep.mubr.msk.bf16.mxu0 %vm2057_vm0, %v2056_v43 }
 0x303   :  { %1797 = vmatprep.subr.bf16.mxu0 %v2056_v43 }
 0x306   :  { %1798 = vmatpush3.bf16.msra.mxu0 %v2001_v20 }
 0x307   :  { %1799 = vmatprep.subr.bf16.mxu0 %v2056_v43 }
 0x30a   :  { %1800 = vmatpush3.bf16.msra.mxu0 %v2002_v21 }
 0x30b   :  { %1801 = vmatprep.subr.bf16.mxu0 %v2056_v43 }
 0x30e   :  { %1802 = vmatpush3.bf16.msra.mxu0 %v2003_v22 }
 0x30f   :  { %1803 = vmatprep.subr.bf16.mxu0 %v2056_v43 }
 0x312   :  { %1804 = vmatpush3.bf16.msra.mxu0 %v2004_v23 }
 0x313   :  { %1805 = vmatprep.subr.bf16.mxu0 %v2056_v43 }
 0x316   :  { %1806 = vmatpush3.bf16.msra.mxu0 %v2005_v25 }
 0x317   :  { %1807 = vmatprep.subr.bf16.mxu0 %v2056_v43 }
 0x31a   :  { %1808 = vmatpush3.bf16.msra.mxu0 %v2006_v28 }
 0x31b   :  { %1809 = vmatprep.subr.bf16.mxu0 %v2056_v43 }
 0x31e   :  { %1810 = vmatpush3.bf16.msra.mxu0 %v2007_v30 }
 0x31f   :  { %1851 = vmatprep.subr.bf16.mxu0 %v2056_v43 }
 0x321   :  { %1812 = vmatmul.mubr.bf16.vlgmr.msra.gmra.mrb[12].mxu0 %v561_v32  ;;  %v1516_v32 = vld [vmem:[#allocation2] ss:$0 sm:$0xff] }
 0x322   :  { %1863 = vmatprep.mubr.msk.bf16.mxu0 %vm2057_vm0, %v2056_v43  ;;  %1852 = vmatpush3.bf16.msra.mxu0 %v2022_v3  ;;  %v770_v33 = vadd.f32 %v1516_v32, %v2458_v6 }
 0x323   :  { %1853 = vmatprep.subr.bf16.mxu0 %v2056_v43 }
 0x326   :  { %1854 = vmatpush3.bf16.msra.mxu0 %v2023_v38 }
 0x327   :  { %1855 = vmatprep.subr.bf16.mxu0 %v2056_v43 }
 0x32a   :  { %1856 = vmatpush3.bf16.msra.mxu0 %v2024_v4 }
 0x32b   :  { %1857 = vmatprep.subr.bf16.mxu0 %v2056_v43 }
 0x32e   :  { %1858 = vmatpush3.bf16.msra.mxu0 %v2025_v5 }
 0x32f   :  { %1859 = vmatprep.subr.bf16.mxu0 %v2056_v43 }
 0x332   :  { %1860 = vmatpush3.bf16.msra.mxu0 %v2026_v7 }
 0x333   :  { %1861 = vmatprep.subr.bf16.mxu0 %v2056_v43 }
 0x336   :  { %1862 = vmatpush3.bf16.msra.mxu0 %v1375_v9 }
 0x3d4   :  { %v983_v42 = vpop.f32.mrb[8].mxu0 }
 0x3d5   :  { %v984_v44 = vadd.f32 %v1561_v41, %v983_v42  ;;  %v1793_v45 = vpop.f32.mrb[9].mxu0 }
 0x3d6   :  { %v986_v46 = vpop.f32.mrb[10].mxu0 }
 0x3d7   :  { %1418 = vrot.lane.b32.xlu0 %v984_v44, %s2058_s28  ;;  %v1794_v47 = vpop.f32.mrb[11].mxu0 }
 0x3f4   :  { %v1096_v49 = vpop.f32.mrb[12].mxu0 }
 0x3f5   :  { %v1097_v50 = vadd.f32 %v1586_v48, %v1096_v49  ;;  %v1813_v51 = vpop.f32.mrb[13].mxu0 }
 0x3f6   :  { %v1099_v52 = vpop.f32.mrb[14].mxu0 }
 0x3f7   :  { %v1102_v53 = vmax.f32 %v1097_v50, 0.0  ;;  %v1814_v54 = vpop.f32.mrb[15].mxu0 }
 0x3f9   :  { %v1103_v56 = vpack.c.bf16 %v1102_v53, %v1102_v53 }
 0x3fb   :  { %1828 = vmatmul.mubr.msk.bf16.vlgmr.msra.gmra.mrb[12].mxu1 %vm727_vm2, %v1103_v56 }
 0x3fc   :  { %1832 = vmatpush3.bf16.msra.mxu1 %v2014_v55  ;;  %1847 = vmatprep.mubr.msk.bf16.mxu1 %vm2057_vm0, %v2056_v43 }
 0x3fd   :  { %1833 = vmatprep.subr.bf16.mxu1 %v2056_v43 }
 0x400   :  { %1834 = vmatpush3.bf16.msra.mxu1 %v2015_v57 }
 0x401   :  { %1835 = vmatprep.subr.bf16.mxu1 %v2056_v43 }
 0x404   :  { %1836 = vmatpush3.bf16.msra.mxu1 %v2016_v58 }
 0x405   :  { %1837 = vmatprep.subr.bf16.mxu1 %v2056_v43 }
 0x408   :  { %1838 = vmatpush3.bf16.msra.mxu1 %v2017_v59 }
 0x409   :  { %1839 = vmatprep.subr.bf16.mxu1 %v2056_v43 }
 0x40c   :  { %1840 = vmatpush3.bf16.msra.mxu1 %v2018_v60 }
 0x40d   :  { %1841 = vmatprep.subr.bf16.mxu1 %v2056_v43 }
 0x410   :  { %1842 = vmatpush3.bf16.msra.mxu1 %v2019_v62 }
 0x411   :  { %1843 = vmatprep.subr.bf16.mxu1 %v2056_v43 }
 0x414   :  { %1844 = vmatpush3.bf16.msra.mxu1 %v2020_v0 }
 0x415   :  { %1845 = vmatprep.subr.bf16.mxu1 %v2056_v43 }
 0x418   :  { %1846 = vmatpush3.bf16.msra.mxu1 %v2021_v14 }
 0x41b   :  { %1848 = vmatmul.mubr.bf16.vlgmr.msra.gmra.mrb[16].mxu1 %v562_v26 }
 0x449   :  { %v1419_v31 = vpop.permute.xlu0 %1418 }
 0x44a   :  { %v1430_v35 = vsel %vm1429_vm3, %v770_v33, %v1419_v31 }
 0x4ce   :  { %v1197_v11 = vpop.f32.mrb[12].mxu1 }
 0x4cf   :  { %v1198_v12 = vadd.f32 %v1606_v10, %v1197_v11  ;;  %v1829_v13 = vpop.f32.mrb[13].mxu1 }
 0x4d0   :  { %v1200_v15 = vpop.f32.mrb[14].mxu1 }
 0x4d1   :  { %1422 = vrot.lane.b32.xlu0 %v1198_v12, %s2059_s8  ;;  %v1830_v16 = vpop.f32.mrb[15].mxu1 }
 0x4ee   :  { %v1310_v43 = vpop.f32.mrb[16].mxu1 }
 0x4ef   :  { %v1311_v18 = vadd.f32 %v1631_v17, %v1310_v43  ;;  %v1849_v19 = vpop.f32.mrb[17].mxu1 }
 0x4f0   :  { %v1313_v20 = vpop.f32.mrb[18].mxu1 }
 0x4f1   :  { %v1316_v21 = vmax.f32 %v1311_v18, 0.0  ;;  %v1850_v22 = vpop.f32.mrb[19].mxu1 }
 0x4f3   :  { %v1317_v23 = vpack.c.bf16 %v1316_v21, %v1316_v21 }
 0x4f5   :  { %1864 = vmatmul.mubr.msk.bf16.vlgmr.msra.gmra.mrb[16].mxu0 %vm727_vm2, %v1317_v23 }
 0x543   :  { %v1423_v34 = vpop.permute.xlu0 %1422 }
 0x544   :  { %v1432_v36 = vsel %vm1431_vm4, %v1430_v35, %v1423_v34 }
 0x5c8   :  { %v1411_v25 = vpop.f32.mrb[16].mxu0 }
 0x5c9   :  { %v1412_v27 = vadd.f32 %v1651_v24, %v1411_v25  ;;  %v1865_v28 = vpop.f32.mrb[17].mxu0 }
 0x5ca   :  { %v1414_v29 = vpop.f32.mrb[18].mxu0 }
 0x5cb   :  { %1426 = vrot.lane.b32.xlu1 %v1412_v27, %s2060_s5  ;;  %v1866_v30 = vpop.f32.mrb[19].mxu0 }
 0x63d   :  { %v1427_v37 = vpop.permute.xlu1 %1426 }
 0x63e   :  { %v1434_v39 = vsel %vm1433_vm5, %v1432_v36, %v1427_v37 }
 0x63f   :  { %1436 = vst.msk [vmem:[%s2607_s7] sm:$0x3] %vm1435_vm6, %v1434_v39 }
 0x640   :  { %1441 = vsyncpa [#allocation3], 1 }

</bundles_post_ra>
